<compile_context>
chip_gen: v7x
topology: tpu7x:2x2x1
jax: 0.10.0
libtpu: 0.0.40
codegen_flags: <defaults>
</compile_context>

<pallas_src>
import jax
import jax.numpy as jnp
from jax.experimental import pallas as pl
from jax.experimental.pallas import tpu as pltpu

_LANES = 128
_SMALL_N = 1 << 16  # below this, plain XLA beats a kernel launch


def _max_tile_rows():
    """VMEM-safe per-step row-tile cap for the current TPU generation."""
    try:
        kind = jax.devices()[0].device_kind.lower()
    except Exception:
        return 2048
    if "v6" in kind or "v7" in kind:
        return 8192   # 4 MiB/buffer; 16 MiB double-buffered (in+out) < 32 MiB scoped default
    if "v5" in kind:
        return 4096   # v5e: 16 MiB scoped default -> keep buffers at 8 MiB
    return 2048       # older / unknown parts: stay conservative


def _pick_tile_rows(rows, max_tile):
    """Row tile: multiple of 8, <= max_tile, and >= 2 grid steps whenever possible."""
    if rows <= 8:
        return rows                       # single full-array block (block == array dims)
    half = max(8, (rows // 2) // 8 * 8)   # guarantee grid >= 2 so v7x's two TCs both run
    return min(max_tile, half)


def _linear1_kernel(w_ref, b_ref, x_ref, o_ref):
    # w_ref, b_ref: (1,) scalars in SMEM; x_ref / o_ref: (tile_r, 128) VMEM tiles.
    o_ref[...] = x_ref[...] * w_ref[0] + b_ref[0]


def _linear1_bulk(x_flat, w_s, b_s):
    """Kernel path for a 128-aligned 1-D chunk. x_flat: (n,), n % 128 == 0."""
    n = x_flat.shape[0]
    rows = n // _LANES
    x2d = x_flat.reshape(rows, _LANES)           # layout-preserving view, no pad / no copy
    tile_r = _pick_tile_rows(rows, _max_tile_rows())
    grid = pl.cdiv(rows, tile_r)                 # last block may be partial (OOB masked)

    out2d = pl.pallas_call(
        _linear1_kernel,
        out_shape=jax.ShapeDtypeStruct((rows, _LANES), jnp.float32),
        grid=(grid,),
        in_specs=[
            pl.BlockSpec(memory_space=pltpu.MemorySpace.SMEM),   # weight scalar
            pl.BlockSpec(memory_space=pltpu.MemorySpace.SMEM),   # bias scalar
            pl.BlockSpec((tile_r, _LANES), lambda i: (i, 0)),    # x row tile
        ],
        out_specs=pl.BlockSpec((tile_r, _LANES), lambda i: (i, 0)),
        compiler_params=pltpu.CompilerParams(
            dimension_semantics=("parallel",)),
        cost_estimate=pl.CostEstimate(
            flops=2 * n, transcendentals=0, bytes_accessed=8 * n),
    )(w_s, b_s, x2d)

    return out2d.reshape(n)


def regression_model_forward(x, weight, bias):
    """y = Linear(1,1)(x[:, None])[:, 0] == x * w + b.  x: (N,) -> (N,)."""
    n = x.shape[0]
    x = x.astype(jnp.float32)
    w = jnp.reshape(weight, ()).astype(jnp.float32)
    b = jnp.reshape(bias, ()).astype(jnp.float32)

    # Small-N fast path: custom-call launch overhead dominates; XLA is strictly faster.
    if n < _SMALL_N:
        return x * w + b

    w_s = jnp.reshape(w, (1,))
    b_s = jnp.reshape(b, (1,))

    n_bulk = (n // _LANES) * _LANES
    if n_bulk == n:
        return _linear1_bulk(x, w_s, b_s)

    # Ragged N: 128-aligned bulk through the kernel, <128-element tail in plain XLA.
    y_bulk = _linear1_bulk(x[:n_bulk], w_s, b_s)
    y_tail = x[n_bulk:] * w + b
    return jnp.concatenate([y_bulk, y_tail])


if __name__ == "__main__":
    key = jax.random.PRNGKey(0)
    kx, kw, kb = jax.random.split(key, 3)

    # Deterministic params mimicking torch.nn.Linear(1, 1) (fan_in = 1 -> U[-1, 1]).
    weight = jax.random.uniform(kw, (1, 1), dtype=jnp.float32, minval=-1.0, maxval=1.0)
    bias = jax.random.uniform(kb, (1,), dtype=jnp.float32, minval=-1.0, maxval=1.0)

    def ref(xv):
        return (xv[:, None] @ weight.T + bias)[:, 0]

    # 1) Small case consistent with the module's 1-D regression input (XLA fast path).
    N = 256
    x = jax.random.normal(kx, (N,), dtype=jnp.float32)
    y = jax.block_until_ready(regression_model_forward(x, weight, bias))
    assert y.shape == (N,)
    assert jnp.allclose(y, ref(x), atol=1e-6, rtol=1e-6), "mismatch (N=256)"

    # 2) 128-aligned large case: kernel path, multi-step grid, no tail.
    N2 = 131_072
    x2 = jax.random.normal(kx, (N2,), dtype=jnp.float32)
    y2 = jax.block_until_ready(regression_model_forward(x2, weight, bias))
    assert y2.shape == (N2,)
    assert jnp.allclose(y2, ref(x2), atol=1e-6, rtol=1e-6), "mismatch (N=131072)"

    # 3) Ragged large case: kernel on the bulk (partial last block) + tiny XLA tail.
    N3 = 200_000
    x3 = jax.random.normal(kx, (N3,), dtype=jnp.float32)
    y3 = jax.block_until_ready(regression_model_forward(x3, weight, bias))
    assert y3.shape == (N3,)
    assert jnp.allclose(y3, ref(x3), atol=1e-6, rtol=1e-6), "mismatch (N=200000)"

    print("KERNEL_OK")
</pallas_src>

<mosaic_0001>
module attributes {stable_mosaic.version = 11 : i64} {
  func.func @_linear1_kernel(%arg0: i32, %arg1: memref<1xf32, #tpu.memory_space<smem>>, %arg2: memref<1xf32, #tpu.memory_space<smem>>, %arg3: memref<512x128xf32, #tpu.memory_space<vmem>>, %arg4: memref<512x128xf32, #tpu.memory_space<vmem>>) attributes {dimension_semantics = [#tpu.dimension_semantics<parallel>], iteration_bounds = array<i64: 2>, scalar_prefetch = 0 : i64, scratch_operands = 0 : i64, tpu.core_type = #tpu.core_type<tc>, window_params = [{transform_indices = @transform_0, window_bounds = array<i64: 1>}, {transform_indices = @transform_1, window_bounds = array<i64: 1>}, {transform_indices = @transform_2, window_bounds = array<i64: 512, 128>}, {transform_indices = @transform_3, window_bounds = array<i64: 512, 128>}]} {
    %c0 = arith.constant 0 : index
    %c0_0 = arith.constant 0 : index
    %0 = vector.load %arg3[%c0, %c0_0] : memref<512x128xf32, #tpu.memory_space<vmem>>, vector<512x128xf32>
    %c0_1 = arith.constant 0 : index
    %1 = memref.load %arg1[%c0_1] : memref<1xf32, #tpu.memory_space<smem>>
    %2 = vector.broadcast %1 : f32 to vector<512x128xf32>
    %3 = arith.mulf %0, %2 : vector<512x128xf32>
    %c0_2 = arith.constant 0 : index
    %4 = memref.load %arg2[%c0_2] : memref<1xf32, #tpu.memory_space<smem>>
    %5 = vector.broadcast %4 : f32 to vector<512x128xf32>
    %6 = arith.addf %3, %5 : vector<512x128xf32>
    %c0_3 = arith.constant 0 : index
    %c0_4 = arith.constant 0 : index
    %7 = vector.load %arg4[%c0_3, %c0_4] : memref<512x128xf32, #tpu.memory_space<vmem>>, vector<512x128xf32>
    tpu.vector_store %arg4[%c0_3, %c0_4], %6 {strides = array<i32>} : memref<512x128xf32, #tpu.memory_space<vmem>>, vector<512x128xf32>,
    return
  }
  func.func @transform_0(%arg0: i32) -> i32 {
    %c0_i32 = arith.constant 0 : i32
    %c0_i32_0 = arith.constant 0 : i32
    return %c0_i32 : i32
  }
  func.func @transform_1(%arg0: i32) -> i32 {
    %c0_i32 = arith.constant 0 : i32
    %c0_i32_0 = arith.constant 0 : i32
    return %c0_i32 : i32
  }
  func.func @transform_2(%arg0: i32) -> (i32, i32) {
    %c0_i32 = arith.constant 0 : i32
    %c0_i32_0 = arith.constant 0 : i32
    return %arg0, %c0_i32 : i32, i32
  }
  func.func @transform_3(%arg0: i32) -> (i32, i32) {
    %c0_i32 = arith.constant 0 : i32
    %c0_i32_0 = arith.constant 0 : i32
    return %arg0, %c0_i32 : i32, i32
  }
}

</mosaic_0001>

<bundles_post_ra>
// kernel: tpu_custom_call.1
= control target key start
LH: loop header
LB: loop body
LE: loop exit
PB: predicated region body
PF: predicated region fallthrough
CT: control target
= control target key end

     0   :  { %s1167_s0 = inlined_call_operand.<no memory space> [shape: f32[1], index: 0, kind: input, shape index: {}]   ;;  %s1168_s1 = inlined_call_operand.<no memory space> [shape: f32[1], index: 1, kind: input, shape index: {}]   ;;  %s1169_s2 = inlined_call_operand.hbm [shape: f32[1024,128], index: 2, kind: input, shape index: {}]   ;;  %s1170_s3 = inlined_call_operand.hbm [shape: f32[1024,128], index: 3, kind: output, shape index: {}]  }
   0x1   :  { %8 = sst [smem:[#allocation2]] %s1167_s0 }
   0x2   :  { %9 = sst [smem:[#allocation3]] %s1168_s1 }
   0x3   :  { %10 = vsyncpa [#allocation5], 0 }
   0x4   :  { %12 = vsyncpa [#allocation5 + $0x1], 0 }
   0x5   :  { %13 = vsyncpa [#allocation6], 0 }
   0x6   :  { %15 = vsyncpa [#allocation6 + $0x1], 0  ;;  %s736_s16 = smov 0   ;;  %s738_s17 = smov 0  }
   0x7   :  { %s740_s18 = smov 0   ;;  %s742_s19 = smov 0  }
   0x8 LB: > { %s757_s0 = sadd.s32 4294967295, %s702_s19   ;;  %s540_s1 = sadd.s32 4294967294, %s702_s19   ;;  %s702_s19 = sphi %s742_s19, %s1183_s19   ;;  %s698_s18 = sphi %s740_s18, %s1182_s18   ;;  %s694_s17 = sphi %s738_s17, %s1181_s17   ;;  %s690_s16 = sphi %s736_s16, %s1180_s16  }
   0x9   : > { %s761_s20 = sadd.s32 1, %s702_s19   ;;  %s70_s21 = sadd.s32 1, %s698_s18 }
   0xa   : > { %s67_s22 = ssub.s32 %s702_s19, %s761_s20  ;;  %p77_p0 = scmp.ne.s32.totalorder %s698_s18, %s694_s17 }
   0xb   : > { %p68_p1 = scmp.eq.s32.totalorder %s67_s22, 0  ;;  %p78_p2 = scmp.eq.s32.totalorder %s702_s19, 0 }
   0xc   : > { %p83_p3 = scmp.ne.s32.totalorder %s694_s17, %s690_s16  ;;  %p84_p4 = scmp.eq.s32.totalorder %s757_s0, 0 }
   0xd   : > { %s773_s23 = scalar_select %p68_p1, %s698_s18, %s70_s21  }
   0xe   : > { %p775_p5 = por %p78_p2, %p77_p0  ;;  %p779_p6 = por %p84_p4, %p83_p3 }
   0xf   : > { %p107_p7 = scmp.eq.s32.totalorder %s757_s0, 1  ;;  %p113_p8 = scmp.eq.s32.totalorder %s540_s1, 1 }
  0x10   : > { %p568_p10 = scmp.lt.s32.totalorder %s702_s19, 2  ;;  %s139_s28 = sand.u32 1, %s698_s18  }
  0x11   : > { %p786_p11 = por %p107_p7, %p77_p0  ;;  %p790_p12 = por %p113_p8, %p83_p3 }
  0x12   : > { %s554_s29 = sshll.u32 %s702_s19, 13  ;;  %s543_s30 = sshll.u32 %s139_s28, 9 }
  0x13   : > { %s1174_s26 = scalar_select %p786_p11, 1, 0 }
  0x14   : > { %s1175_s27 = scalar_select %p790_p12, 1, 0 }
  0x15   : > { %s799_s6 = scalar_lea.hbm %s1169_s2, %s554_s29  ;;  %s143_s7 = scalar_lea.vmem [#allocation4], %s543_s30 }
  0x16   : > { %s150_s8 = sshll.u32 %s143_s7, 4  ;;  %p803_p13 = pnand %p568_p10, %p775_p5  ;;  %s807_s8 = int_to_ptr.vmem [resolvable:$true] %s150_s8 }
  0x17   : > { %s809_s10 = scalar_lea.sflag [#allocation5], %s139_s28  ;;  %s606_s11 = scalar_lea.hbm %s799_s6, 8192 }
  0x18   : > { %p607_p0 = scmp.ne.s32.totalorder %s799_s6, %s606_s11  ;;  %p608_p1 = pneg %p803_p13 }
  0x19   : > { %s611_s14 = scalar_lea.hbm %s1169_s2, 16384  ;;  %p612_p4 = scmp.lt.u32.totalorder %s799_s6, %s1169_s2 }
  0x1a   : > { %p609_p2 = pnand %p608_p1, %p607_p0  ;;  %p613_p5 = scmp.lt.u32.totalorder %s611_s14, %s606_s11 }
  0x1b   : > { %p615_p8 = scmp.lt.u32.totalorder %s606_s11, %s799_s6 }
  0x1c   : > { %p610_p3 = pneg %p609_p2  ;;  %p614_p7 = por %p613_p5, %p612_p4 }
  0x1e   : > { %p616_p10 = por %p615_p8, %p614_p7 }
  0x20   : > { %p617_p9 = pnand %p616_p10, %p610_p3 }
  0x22   : > { %620 = shalt.err (!%p617_p9)
}
  0x23   : > { %s621_s21 = scalar_lea.vmem %s807_s8, 8192  ;;  %s704_s22 = smov [#allocation4]  }
  0x24   : > { %p622_p0 = scmp.ne.s32.totalorder %s807_s8, %s621_s21  ;;  %s626_s24 = sshll.u32 %s704_s22, 4  ;;  %s627_s24 = int_to_ptr.vmem [resolvable:$false] %s626_s24 }
  0x25   : > { %s628_s28 = scalar_lea.vmem %s627_s24, 16384  ;;  %p629_p11 = scmp.lt.s32.totalorder %s807_s8, %s627_s24 }
  0x26   : > { %p624_p2 = pnand %p622_p0, %p608_p1  ;;  %p630_p4 = scmp.lt.s32.totalorder %s628_s28, %s621_s21 }
  0x28   : > { %p625_p12 = pneg %p624_p2  ;;  %p631_p5 = por %p630_p4, %p629_p11 }
  0x2a   : > { %p632_p7 = pnand %p631_p5, %p625_p12 }
  0x2c   : > { %635 = shalt.err (!%p632_p7)
}
  0x2d   : > { %s705_s29 = smov 128   ;;  %s706_s30 = smov 8  }
  0x2e   : > { %563 = dma.hbm_to_vmem [thread:$0]  (!%p803_p13), %s799_s6, 8192, %s807_s8, %s809_s10, %s705_s29, %s705_s29, %s706_s30  }
  0x2f   : > { %p546_p9 = scmp.ge.s32.totalorder %s702_s19, 1  ;;  %p158_p1 = scmp.lt.s32.totalorder %s702_s19, 3 }
  0x31   : > { %p159_p3 = pnand %p546_p9, %p158_p1 }
  0x32   : > { %s840_s4 = sand.u32 (!%p159_p3), 1, %s694_s17  }
  0x33   : > { %162 = sbr.rel (%p159_p3) target bundleno = 122 (0x7a), region = 32  ;;  %s547_s5 = sshll.u32 (!%p159_p3), %s840_s4, 9 }
  0x34   : > { %s165_s7 = scalar_lea.sflag (!%p159_p3), [#allocation5], %s840_s4  ;;  %s846_s11 = scalar_lea.vmem (!%p159_p3), [#allocation4], %s547_s5 }
  0x3a   : > { %681 = dma.done.wait (%p779_p6), %s165_s7, 8192  }
  0x3b   : > { %683 = vsyncadd (%p779_p6), %s165_s7, 4294959104  ;;  %s257_s6 = sld [smem:[#allocation2]]  ;;  %v193_v0 = vld [vmem:[%s846_s11] sm:$0xff]  ;;  %v194_v3 = vld [vmem:[%s846_s11 + $0x8] sm:$0xff]  ;;  %s885_s25 = scalar_lea.vmem [#allocation7], %s547_s5 }
  0x3c   : > { %s323_s8 = sld [smem:[#allocation3]]  ;;  %v195_v6 = vld [vmem:[%s846_s11 + $0x10] sm:$0xff]  ;;  %v196_v7 = vld [vmem:[%s846_s11 + $0x18] sm:$0xff]  ;;  %v197_v8 = vld [vmem:[%s846_s11 + $0x20] sm:$0xff]  ;;  %s555_s9 = sshll.u32 %s757_s0, 13 }
  0x3d   : > { %v198_v12 = vld [vmem:[%s846_s11 + $0x28] sm:$0xff]  ;;  %v199_v13 = vld [vmem:[%s846_s11 + $0x30] sm:$0xff]  ;;  %v200_v14 = vld [vmem:[%s846_s11 + $0x38] sm:$0xff]  ;;  %s467_s10 = sshll.u32 %s885_s25, 4  ;;  %s1114_s13 = scalar_lea.hbm %s1170_s3, %s555_s9  ;;  %s1116_s10 = int_to_ptr.vmem [resolvable:$true] %s467_s10 }
  0x3e   : > { %v201_v19 = vld [vmem:[%s846_s11 + $0x40] sm:$0xff]  ;;  %v202_v20 = vld [vmem:[%s846_s11 + $0x48] sm:$0xff]  ;;  %v203_v21 = vld [vmem:[%s846_s11 + $0x50] sm:$0xff]  ;;  %s454_s14 = scalar_lea.sflag [#allocation6], %s840_s4  ;;  %s636_s15 = scalar_lea.vmem %s1116_s10, 8192 }
  0x3f   : > { %v204_v26 = vld [vmem:[%s846_s11 + $0x58] sm:$0xff]  ;;  %v205_v27 = vld [vmem:[%s846_s11 + $0x60] sm:$0xff]  ;;  %v206_v28 = vld [vmem:[%s846_s11 + $0x68] sm:$0xff]  ;;  %p637_p6 = scmp.ne.s32.totalorder %s1116_s10, %s636_s15  ;;  %p1177_p11 = scmp.ne.s32.totalorder %s1174_s26, 0 }
  0x40   : > { %v207_v33 = vld [vmem:[%s846_s11 + $0x70] sm:$0xff]  ;;  %v208_v34 = vld [vmem:[%s846_s11 + $0x78] sm:$0xff]  ;;  %v209_v39 = vld [vmem:[%s846_s11 + $0x80] sm:$0xff]  ;;  %s707_s1 = smov [#allocation7]  }
  0x41   : > { %v853_v1 = vstv %s257_s6  ;;  %v210_v40 = vld [vmem:[%s846_s11 + $0x88] sm:$0xff]  ;;  %v211_v45 = vld [vmem:[%s846_s11 + $0x90] sm:$0xff]  ;;  %v212_v46 = vld [vmem:[%s846_s11 + $0x98] sm:$0xff]  ;;  %p638_p12 = pnand %p637_p6, %p1177_p11  ;;  %s640_s21 = sshll.u32 %s707_s1, 4  ;;  %s641_s21 = int_to_ptr.vmem [resolvable:$false] %s640_s21 }
  0x42   : > { %v855_v2 = vstv %s323_s8  ;;  %v259_v4 = vmul.f32 %v853_v1, %v193_v0  ;;  %v260_v5 = vmul.f32 %v853_v1, %v194_v3  ;;  %v261_v9 = vmul.f32 %v853_v1, %v195_v6  ;;  %v213_v47 = vld [vmem:[%s846_s11 + $0xa0] sm:$0xff]  ;;  %v214_v52 = vld [vmem:[%s846_s11 + $0xa8] sm:$0xff]  ;;  %v215_v53 = vld [vmem:[%s846_s11 + $0xb0] sm:$0xff]  ;;  %s642_s22 = scalar_lea.vmem %s641_s21, 16384  ;;  %p643_p8 = scmp.lt.s32.totalorder %s1116_s10, %s641_s21 }
  0x43   : > { %v262_v10 = vmul.f32 %v853_v1, %v196_v7  ;;  %v263_v11 = vmul.f32 %v853_v1, %v197_v8  ;;  %v264_v17 = vmul.f32 %v853_v1, %v198_v12  ;;  %v265_v18 = vmul.f32 %v853_v1, %v199_v13  ;;  %v216_v58 = vld [vmem:[%s846_s11 + $0xb8] sm:$0xff]  ;;  %v217_v63 = vld [vmem:[%s846_s11 + $0xc0] sm:$0xff]  ;;  %v218_v0 = vld [vmem:[%s846_s11 + $0xc8] sm:$0xff]  ;;  %p639_p13 = pneg %p638_p12  ;;  %p644_p10 = scmp.lt.s32.totalorder %s642_s22, %s636_s15 }
  0x44   : > { %v325_v15 = vadd.f32 %v855_v2, %v259_v4  ;;  %v326_v16 = vadd.f32 %v855_v2, %v260_v5  ;;  %v327_v22 = vadd.f32 %v855_v2, %v261_v9  ;;  %v266_v25 = vmul.f32 %v853_v1, %v200_v14  ;;  %v219_v7 = vld [vmem:[%s846_s11 + $0xd0] sm:$0xff]  ;;  %v220_v8 = vld [vmem:[%s846_s11 + $0xd8] sm:$0xff]  ;;  %v221_v9 = vld [vmem:[%s846_s11 + $0xe0] sm:$0xff] }
  0x45   : > { %v328_v23 = vadd.f32 %v855_v2, %v262_v10  ;;  %v329_v24 = vadd.f32 %v855_v2, %v263_v11  ;;  %v330_v29 = vadd.f32 %v855_v2, %v264_v17  ;;  %v331_v30 = vadd.f32 %v855_v2, %v265_v18  ;;  %v222_v14 = vld [vmem:[%s846_s11 + $0xe8] sm:$0xff]  ;;  %p645_p0 = por %p644_p10, %p643_p8 }
  0x46   : > { %389 = vst [vmem:[%s885_s25] sm:$0xff] %v325_v15  ;;  %390 = vst [vmem:[%s885_s25 + $0x8] sm:$0xff] %v326_v16  ;;  %v267_v31 = vmul.f32 %v853_v1, %v201_v19  ;;  %v268_v32 = vmul.f32 %v853_v1, %v202_v20  ;;  %v332_v35 = vadd.f32 %v855_v2, %v266_v25  ;;  %v223_v15 = vld [vmem:[%s846_s11 + $0xf0] sm:$0xff]  ;;  %v224_v20 = vld [vmem:[%s846_s11 + $0xf8] sm:$0xff] }
  0x47   : > { %391 = vst [vmem:[%s885_s25 + $0x10] sm:$0xff] %v327_v22  ;;  %392 = vst [vmem:[%s885_s25 + $0x18] sm:$0xff] %v328_v23  ;;  %v269_v36 = vmul.f32 %v853_v1, %v203_v21  ;;  %v270_v37 = vmul.f32 %v853_v1, %v204_v26  ;;  %v271_v38 = vmul.f32 %v853_v1, %v205_v27  ;;  %v225_v25 = vld [vmem:[%s846_s11 + $0x100] sm:$0xff]  ;;  %v226_v26 = vld [vmem:[%s846_s11 + $0x108] sm:$0xff]  ;;  %p646_p2 = pnand %p645_p0, %p639_p13 }
  0x48   : > { %393 = vst [vmem:[%s885_s25 + $0x20] sm:$0xff] %v329_v24  ;;  %394 = vst [vmem:[%s885_s25 + $0x28] sm:$0xff] %v330_v29  ;;  %v333_v41 = vadd.f32 %v855_v2, %v267_v31  ;;  %v334_v42 = vadd.f32 %v855_v2, %v268_v32  ;;  %v272_v43 = vmul.f32 %v853_v1, %v206_v28  ;;  %v227_v31 = vld [vmem:[%s846_s11 + $0x110] sm:$0xff]  ;;  %v228_v32 = vld [vmem:[%s846_s11 + $0x118] sm:$0xff] }
  0x49   : > { %395 = vst [vmem:[%s885_s25 + $0x30] sm:$0xff] %v331_v30  ;;  %v273_v44 = vmul.f32 %v853_v1, %v207_v33  ;;  %396 = vst [vmem:[%s885_s25 + $0x38] sm:$0xff] %v332_v35  ;;  %v335_v48 = vadd.f32 %v855_v2, %v269_v36  ;;  %v336_v49 = vadd.f32 %v855_v2, %v270_v37  ;;  %v229_v33 = vld [vmem:[%s846_s11 + $0x120] sm:$0xff] }
  0x4a   : > { %v337_v50 = vadd.f32 %v855_v2, %v271_v38  ;;  %v274_v51 = vmul.f32 %v853_v1, %v208_v34  ;;  %397 = vst [vmem:[%s885_s25 + $0x40] sm:$0xff] %v333_v41  ;;  %398 = vst [vmem:[%s885_s25 + $0x48] sm:$0xff] %v334_v42  ;;  %v338_v54 = vadd.f32 %v855_v2, %v272_v43  ;;  %v230_v38 = vld [vmem:[%s846_s11 + $0x128] sm:$0xff] }
  0x4b   : > { %v339_v55 = vadd.f32 %v855_v2, %v273_v44  ;;  %v275_v56 = vmul.f32 %v853_v1, %v209_v39  ;;  %v276_v57 = vmul.f32 %v853_v1, %v210_v40  ;;  %399 = vst [vmem:[%s885_s25 + $0x50] sm:$0xff] %v335_v48  ;;  %400 = vst [vmem:[%s885_s25 + $0x58] sm:$0xff] %v336_v49  ;;  %v231_v39 = vld [vmem:[%s846_s11 + $0x130] sm:$0xff]  ;;  %v232_v44 = vld [vmem:[%s846_s11 + $0x138] sm:$0xff] }
  0x4c   : > { %401 = vst [vmem:[%s885_s25 + $0x60] sm:$0xff] %v337_v50  ;;  %v340_v59 = vadd.f32 %v855_v2, %v274_v51  ;;  %v277_v60 = vmul.f32 %v853_v1, %v211_v45  ;;  %v278_v61 = vmul.f32 %v853_v1, %v212_v46  ;;  %v279_v62 = vmul.f32 %v853_v1, %v213_v47  ;;  %v233_v49 = vld [vmem:[%s846_s11 + $0x140] sm:$0xff]  ;;  %v234_v50 = vld [vmem:[%s846_s11 + $0x148] sm:$0xff] }
  0x4d   : > { %402 = vst [vmem:[%s885_s25 + $0x68] sm:$0xff] %v338_v54  ;;  %403 = vst [vmem:[%s885_s25 + $0x70] sm:$0xff] %v339_v55  ;;  %v341_v3 = vadd.f32 %v855_v2, %v275_v56  ;;  %v342_v4 = vadd.f32 %v855_v2, %v276_v57  ;;  %v280_v5 = vmul.f32 %v853_v1, %v214_v52  ;;  %v235_v55 = vld [vmem:[%s846_s11 + $0x150] sm:$0xff]  ;;  %v236_v56 = vld [vmem:[%s846_s11 + $0x158] sm:$0xff] }
  0x4e   : > { %v281_v6 = vmul.f32 %v853_v1, %v215_v53  ;;  %404 = vst [vmem:[%s885_s25 + $0x78] sm:$0xff] %v340_v59  ;;  %v343_v10 = vadd.f32 %v855_v2, %v277_v60  ;;  %v344_v11 = vadd.f32 %v855_v2, %v278_v61  ;;  %v345_v12 = vadd.f32 %v855_v2, %v279_v62  ;;  %v237_v57 = vld [vmem:[%s846_s11 + $0x160] sm:$0xff]  ;;  %v238_v62 = vld [vmem:[%s846_s11 + $0x168] sm:$0xff] }
  0x4f   : > { %v282_v13 = vmul.f32 %v853_v1, %v216_v58  ;;  %405 = vst [vmem:[%s885_s25 + $0x80] sm:$0xff] %v341_v3  ;;  %406 = vst [vmem:[%s885_s25 + $0x88] sm:$0xff] %v342_v4  ;;  %v346_v16 = vadd.f32 %v855_v2, %v280_v5  ;;  %v283_v18 = vmul.f32 %v853_v1, %v217_v63  ;;  %v239_v63 = vld [vmem:[%s846_s11 + $0x170] sm:$0xff] }
  0x50   : > { %v347_v17 = vadd.f32 %v855_v2, %v281_v6  ;;  %v284_v19 = vmul.f32 %v853_v1, %v218_v0  ;;  %407 = vst [vmem:[%s885_s25 + $0x90] sm:$0xff] %v343_v10  ;;  %408 = vst [vmem:[%s885_s25 + $0x98] sm:$0xff] %v344_v11  ;;  %v285_v22 = vmul.f32 %v853_v1, %v219_v7  ;;  %v240_v6 = vld [vmem:[%s846_s11 + $0x178] sm:$0xff]  ;;  %v241_v11 = vld [vmem:[%s846_s11 + $0x180] sm:$0xff] }
  0x51   : > { %409 = vst [vmem:[%s885_s25 + $0xa0] sm:$0xff] %v345_v12  ;;  %v348_v21 = vadd.f32 %v855_v2, %v282_v13  ;;  %v286_v23 = vmul.f32 %v853_v1, %v220_v8  ;;  %v287_v24 = vmul.f32 %v853_v1, %v221_v9  ;;  %410 = vst [vmem:[%s885_s25 + $0xa8] sm:$0xff] %v346_v16  ;;  %v242_v12 = vld [vmem:[%s846_s11 + $0x188] sm:$0xff] }
  0x52   : > { %411 = vst [vmem:[%s885_s25 + $0xb0] sm:$0xff] %v347_v17  ;;  %v349_v27 = vadd.f32 %v855_v2, %v283_v18  ;;  %v350_v28 = vadd.f32 %v855_v2, %v284_v19  ;;  %v288_v29 = vmul.f32 %v853_v1, %v222_v14  ;;  %v289_v30 = vmul.f32 %v853_v1, %v223_v15  ;;  %v243_v17 = vld [vmem:[%s846_s11 + $0x190] sm:$0xff]  ;;  %v244_v18 = vld [vmem:[%s846_s11 + $0x198] sm:$0xff]  ;;  %v245_v19 = vld [vmem:[%s846_s11 + $0x1a0] sm:$0xff] }
  0x53   : > { %412 = vst [vmem:[%s885_s25 + $0xb8] sm:$0xff] %v348_v21  ;;  %v351_v34 = vadd.f32 %v855_v2, %v285_v22  ;;  %v352_v35 = vadd.f32 %v855_v2, %v286_v23  ;;  %v353_v36 = vadd.f32 %v855_v2, %v287_v24  ;;  %v290_v37 = vmul.f32 %v853_v1, %v224_v20  ;;  %v246_v24 = vld [vmem:[%s846_s11 + $0x1a8] sm:$0xff] }
  0x54   : > { %413 = vst [vmem:[%s885_s25 + $0xc0] sm:$0xff] %v349_v27  ;;  %414 = vst [vmem:[%s885_s25 + $0xc8] sm:$0xff] %v350_v28  ;;  %v354_v40 = vadd.f32 %v855_v2, %v288_v29  ;;  %v355_v41 = vadd.f32 %v855_v2, %v289_v30  ;;  %v291_v42 = vmul.f32 %v853_v1, %v225_v25  ;;  %v247_v25 = vld [vmem:[%s846_s11 + $0x1b0] sm:$0xff]  ;;  %v248_v30 = vld [vmem:[%s846_s11 + $0x1b8] sm:$0xff] }
  0x55   : > { %v292_v43 = vmul.f32 %v853_v1, %v226_v26  ;;  %415 = vst [vmem:[%s885_s25 + $0xd0] sm:$0xff] %v351_v34  ;;  %416 = vst [vmem:[%s885_s25 + $0xd8] sm:$0xff] %v352_v35  ;;  %v356_v45 = vadd.f32 %v855_v2, %v290_v37  ;;  %v293_v46 = vmul.f32 %v853_v1, %v227_v31  ;;  %v249_v35 = vld [vmem:[%s846_s11 + $0x1c0] sm:$0xff] }
  0x56   : > { %417 = vst [vmem:[%s885_s25 + $0xe0] sm:$0xff] %v353_v36  ;;  %v294_v47 = vmul.f32 %v853_v1, %v228_v32  ;;  %v295_v48 = vmul.f32 %v853_v1, %v229_v33  ;;  %418 = vst [vmem:[%s885_s25 + $0xe8] sm:$0xff] %v354_v40  ;;  %v357_v51 = vadd.f32 %v855_v2, %v291_v42  ;;  %v250_v36 = vld [vmem:[%s846_s11 + $0x1c8] sm:$0xff]  ;;  %v252_v42 = vld [vmem:[%s846_s11 + $0x1d8] sm:$0xff] }
  0x57   : > { %419 = vst [vmem:[%s885_s25 + $0xf0] sm:$0xff] %v355_v41  ;;  %v358_v52 = vadd.f32 %v855_v2, %v292_v43  ;;  %v296_v53 = vmul.f32 %v853_v1, %v230_v38  ;;  %v297_v54 = vmul.f32 %v853_v1, %v231_v39  ;;  %420 = vst [vmem:[%s885_s25 + $0xf8] sm:$0xff] %v356_v45  ;;  %v251_v41 = vld [vmem:[%s846_s11 + $0x1d0] sm:$0xff]  ;;  %v253_v43 = vld [vmem:[%s846_s11 + $0x1e0] sm:$0xff] }
  0x58   : > { %v359_v58 = vadd.f32 %v855_v2, %v293_v46  ;;  %v360_v59 = vadd.f32 %v855_v2, %v294_v47  ;;  %v361_v60 = vadd.f32 %v855_v2, %v295_v48  ;;  %v298_v61 = vmul.f32 %v853_v1, %v232_v44  ;;  %421 = vst [vmem:[%s885_s25 + $0x100] sm:$0xff] %v357_v51  ;;  %v254_v48 = vld [vmem:[%s846_s11 + $0x1e8] sm:$0xff] }
  0x59   : > { %422 = vst [vmem:[%s885_s25 + $0x108] sm:$0xff] %v358_v52  ;;  %v362_v0 = vadd.f32 %v855_v2, %v296_v53  ;;  %v363_v3 = vadd.f32 %v855_v2, %v297_v54  ;;  %v299_v4 = vmul.f32 %v853_v1, %v233_v49  ;;  %v300_v5 = vmul.f32 %v853_v1, %v234_v50  ;;  %v255_v49 = vld [vmem:[%s846_s11 + $0x1f0] sm:$0xff]  ;;  %v256_v54 = vld [vmem:[%s846_s11 + $0x1f8] sm:$0xff] }
  0x5a   : > { %423 = vst [vmem:[%s885_s25 + $0x110] sm:$0xff] %v359_v58  ;;  %424 = vst [vmem:[%s885_s25 + $0x118] sm:$0xff] %v360_v59  ;;  %v364_v7 = vadd.f32 %v855_v2, %v298_v61  ;;  %v301_v8 = vmul.f32 %v853_v1, %v235_v55  ;;  %v302_v9 = vmul.f32 %v853_v1, %v236_v56 }
  0x5b   : > { %425 = vst [vmem:[%s885_s25 + $0x120] sm:$0xff] %v361_v60  ;;  %v303_v10 = vmul.f32 %v853_v1, %v237_v57  ;;  %426 = vst [vmem:[%s885_s25 + $0x128] sm:$0xff] %v362_v0  ;;  %v365_v13 = vadd.f32 %v855_v2, %v299_v4  ;;  %v366_v14 = vadd.f32 %v855_v2, %v300_v5 }
  0x5c   : > { %427 = vst [vmem:[%s885_s25 + $0x130] sm:$0xff] %v363_v3  ;;  %v304_v15 = vmul.f32 %v853_v1, %v238_v62  ;;  %v305_v16 = vmul.f32 %v853_v1, %v239_v63  ;;  %428 = vst [vmem:[%s885_s25 + $0x138] sm:$0xff] %v364_v7  ;;  %v367_v20 = vadd.f32 %v855_v2, %v301_v8 }
  0x5d   : > { %v368_v21 = vadd.f32 %v855_v2, %v302_v9  ;;  %v369_v22 = vadd.f32 %v855_v2, %v303_v10  ;;  %v306_v23 = vmul.f32 %v853_v1, %v240_v6  ;;  %429 = vst [vmem:[%s885_s25 + $0x140] sm:$0xff] %v365_v13  ;;  %430 = vst [vmem:[%s885_s25 + $0x148] sm:$0xff] %v366_v14 }
  0x5e   : > { %v370_v26 = vadd.f32 %v855_v2, %v304_v15  ;;  %v371_v27 = vadd.f32 %v855_v2, %v305_v16  ;;  %v307_v28 = vmul.f32 %v853_v1, %v241_v11  ;;  %v308_v29 = vmul.f32 %v853_v1, %v242_v12  ;;  %431 = vst [vmem:[%s885_s25 + $0x150] sm:$0xff] %v367_v20 }
  0x5f   : > { %432 = vst [vmem:[%s885_s25 + $0x158] sm:$0xff] %v368_v21  ;;  %433 = vst [vmem:[%s885_s25 + $0x160] sm:$0xff] %v369_v22  ;;  %v372_v31 = vadd.f32 %v855_v2, %v306_v23  ;;  %v309_v32 = vmul.f32 %v853_v1, %v243_v17  ;;  %v310_v33 = vmul.f32 %v853_v1, %v244_v18 }
  0x60   : > { %v311_v34 = vmul.f32 %v853_v1, %v245_v19  ;;  %434 = vst [vmem:[%s885_s25 + $0x168] sm:$0xff] %v370_v26  ;;  %435 = vst [vmem:[%s885_s25 + $0x170] sm:$0xff] %v371_v27  ;;  %v373_v37 = vadd.f32 %v855_v2, %v307_v28  ;;  %v374_v38 = vadd.f32 %v855_v2, %v308_v29 }
  0x61   : > { %v312_v39 = vmul.f32 %v853_v1, %v246_v24  ;;  %v313_v40 = vmul.f32 %v853_v1, %v247_v25  ;;  %436 = vst [vmem:[%s885_s25 + $0x178] sm:$0xff] %v372_v31  ;;  %v375_v44 = vadd.f32 %v855_v2, %v309_v32  ;;  %v376_v45 = vadd.f32 %v855_v2, %v310_v33 }
  0x62   : > { %v377_v46 = vadd.f32 %v855_v2, %v311_v34  ;;  %v314_v47 = vmul.f32 %v853_v1, %v248_v30  ;;  %437 = vst [vmem:[%s885_s25 + $0x180] sm:$0xff] %v373_v37  ;;  %438 = vst [vmem:[%s885_s25 + $0x188] sm:$0xff] %v374_v38  ;;  %v315_v52 = vmul.f32 %v853_v1, %v249_v35 }
  0x63   : > { %v378_v50 = vadd.f32 %v855_v2, %v312_v39  ;;  %v379_v51 = vadd.f32 %v855_v2, %v313_v40  ;;  %v316_v53 = vmul.f32 %v853_v1, %v250_v36  ;;  %439 = vst [vmem:[%s885_s25 + $0x190] sm:$0xff] %v375_v44  ;;  %440 = vst [vmem:[%s885_s25 + $0x198] sm:$0xff] %v376_v45 }
  0x64   : > { %441 = vst [vmem:[%s885_s25 + $0x1a0] sm:$0xff] %v377_v46  ;;  %v380_v55 = vadd.f32 %v855_v2, %v314_v47  ;;  %v317_v56 = vmul.f32 %v853_v1, %v251_v41  ;;  %v318_v57 = vmul.f32 %v853_v1, %v252_v42  ;;  %v319_v58 = vmul.f32 %v853_v1, %v253_v43 }
  0x65   : > { %442 = vst [vmem:[%s885_s25 + $0x1a8] sm:$0xff] %v378_v50  ;;  %443 = vst [vmem:[%s885_s25 + $0x1b0] sm:$0xff] %v379_v51  ;;  %v381_v59 = vadd.f32 %v855_v2, %v315_v52  ;;  %v382_v60 = vadd.f32 %v855_v2, %v316_v53  ;;  %v320_v61 = vmul.f32 %v853_v1, %v254_v48 }
  0x66   : > { %v321_v62 = vmul.f32 %v853_v1, %v255_v49  ;;  %444 = vst [vmem:[%s885_s25 + $0x1b8] sm:$0xff] %v380_v55  ;;  %v383_v63 = vadd.f32 %v855_v2, %v317_v56  ;;  %v384_v0 = vadd.f32 %v855_v2, %v318_v57  ;;  %v385_v3 = vadd.f32 %v855_v2, %v319_v58 }
  0x67   : > { %v322_v4 = vmul.f32 %v853_v1, %v256_v54  ;;  %445 = vst [vmem:[%s885_s25 + $0x1c0] sm:$0xff] %v381_v59  ;;  %446 = vst [vmem:[%s885_s25 + $0x1c8] sm:$0xff] %v382_v60  ;;  %v386_v5 = vadd.f32 %v855_v2, %v320_v61 }
  0x68   : > { %v387_v6 = vadd.f32 %v855_v2, %v321_v62  ;;  %447 = vst [vmem:[%s885_s25 + $0x1d0] sm:$0xff] %v383_v63  ;;  %448 = vst [vmem:[%s885_s25 + $0x1d8] sm:$0xff] %v384_v0 }
  0x69   : > { %449 = vst [vmem:[%s885_s25 + $0x1e0] sm:$0xff] %v385_v3  ;;  %v388_v1 = vadd.f32 %v855_v2, %v322_v4  ;;  %450 = vst [vmem:[%s885_s25 + $0x1e8] sm:$0xff] %v386_v5 }
  0x6a   : > { %451 = vst [vmem:[%s885_s25 + $0x1f0] sm:$0xff] %v387_v6 }
  0x6b   : > { %452 = vst [vmem:[%s885_s25 + $0x1f8] sm:$0xff] %v388_v1 }
  0x6c   : > { %649 = shalt.err (!%p646_p2)
}
  0x6d   : > { %s650_s24 = scalar_lea.hbm %s1114_s13, 8192  ;;  %s654_s30 = scalar_lea.hbm %s1170_s3, 16384 }
  0x6e   : > { %p651_p4 = scmp.ne.s32.totalorder %s1114_s13, %s650_s24  ;;  %p655_p9 = scmp.lt.u32.totalorder %s1114_s13, %s1170_s3 }
  0x6f   : > { %p656_p1 = scmp.lt.u32.totalorder %s654_s30, %s650_s24  ;;  %p658_p6 = scmp.lt.u32.totalorder %s650_s24, %s1114_s13 }
  0x70   : > { %p652_p5 = pnand %p651_p4, %p1177_p11 }
  0x71   : > { %p657_p3 = por %p656_p1, %p655_p9 }
  0x72   : > { %p653_p7 = pneg %p652_p5 }
  0x73   : > { %p659_p12 = por %p658_p6, %p657_p3 }
  0x75   : > { %p660_p13 = pnand %p659_p12, %p653_p7 }
  0x77   : > { %663 = shalt.err (!%p660_p13)
}
  0x78   : > { %s708_s11 = smov 128   ;;  %s709_s6 = smov 8  }
  0x79   : > { %558 = dma.vmem_to_hbm [thread:$0]  (%p1177_p11), %s1116_s10, 8192, %s1114_s13, %s454_s14, %s708_s11, %s708_s11, %s709_s6  }
  0x7a PF: > { %s482_s8 = sand.u32 1, %s690_s16   ;;  %p1178_p8 = scmp.ne.s32.totalorder %s1175_s27, 0 }
  0x7b   : > { %p1179_p10 = scmp.ge.s32.totalorder %s702_s19, 2  ;;  %s483_s25 = scalar_lea.sflag [#allocation6], %s482_s8 }
  0x7d   : > { %p565_p0 = pnand %p1179_p10, %p1178_p8 }
  0x7f   : > { %685 = dma.done.wait (!%p565_p0), %s483_s25, 8192  }
  0x80   : > { %687 = vsyncadd (!%p565_p0), %s483_s25, 4294959104  ;;  %p18_p2 = scmp.ge.s32.totalorder %s761_s20, 4   ;;  %s1180_s16 = smov %s694_s17 }
  0x81   : > { %s1181_s17 = smov %s698_s18  ;;  %s1182_s18 = smov %s773_s23 }
  0x82   : > { %s1183_s19 = smov %s761_s20  ;;  %20 = sbr.rel (!%p18_p2) target bundleno = 8 (0x8), region = 77 }
  0x89   :  { %488 = vsyncpa [#allocation5], 1 }
  0x8a   :  { %490 = vsyncpa [#allocation5 + $0x1], 1 }
  0x8b   :  { %491 = vsyncpa [#allocation6], 1 }
  0x8c   :  { %493 = vsyncpa [#allocation6 + $0x1], 1 }

</bundles_post_ra>
